<compile_context>
chip_gen: v7x
topology: tpu7x:2x2x1
jax: 0.10.0
libtpu: 0.0.40
codegen_flags: <defaults>
</compile_context>

<pallas_src>
import jax
import jax.numpy as jnp
from jax.experimental import pallas as pl
from jax.experimental.pallas import tpu as pltpu

_TILE_BYTES = 4 * 1024 * 1024        # target x-tile size (~4 MiB)
_MAX_LANE_TILE = 8192                # lane-tile cap (multiple of 128)
_MIN_PALLAS_BYTES = 512 * 1024       # below this, a fused XLA add wins
_VMEM_LIMIT = 32 * 1024 * 1024       # safe on v5e/v6e/v7x (v7x: 64 MiB phys)
                                     # 2x(4 MiB in) + 2x(4 MiB out) + bias ~ 16 MiB live


def _add_bias_kernel(x_ref, b_ref, o_ref):
    # Pure VPU broadcast-add.
    #   4D path: (tn, tc, tk) + (tc, 1) -> (tn, tc, tk)
    #   2D path: (tr, tk)     + (1, tk) -> (tr, tk)
    o_ref[...] = x_ref[...] + b_ref[...]


def _round_up(v, m):
    return -(-v // m) * m


def _sublane(dtype):
    # Minimum second-to-last block dim: 8 (f32), 16 (bf16/f16), 32 (int8/fp8).
    return max(8, 32 // jnp.dtype(dtype).itemsize)


def _lane_tile(cols):
    """Lane (last-dim) tile: full extent when modest, else the largest
    128-multiple divisor of `cols` (unmasked stores, full-size DMAs),
    else the cap."""
    if cols <= _MAX_LANE_TILE:
        return cols
    for t in range(_MAX_LANE_TILE, 127, -128):
        if cols % t == 0:
            return t
    return _MAX_LANE_TILE


def _cost(x, bias):
    # Pure bandwidth op: read x + bias, write out.
    return pl.CostEstimate(flops=x.size, transcendentals=0,
                           bytes_accessed=2 * x.nbytes + bias.nbytes)


def _tiles_4d(N, C, HW, dtype):
    """Pick (tn, tc, tk) for the (N, C, HW) view, byte-budgeted & dtype-aware."""
    sub = _sublane(dtype)
    budget = max(1, _TILE_BYTES // jnp.dtype(dtype).itemsize)  # elems per tile

    tk = _lane_tile(HW)
    if C * tk <= budget:
        tc = C                                        # full extent: always legal
    else:
        tc = max(sub, (budget // tk) // sub * sub)    # multiple of sublane min
    tn = max(1, min(N, budget // (tc * tk)))

    # Guarantee >=2 grid blocks along a "parallel" axis when possible so v7x's
    # two TensorCores both stream HBM (single-step grids run on one TC).
    if pl.cdiv(N, tn) * pl.cdiv(C, tc) * pl.cdiv(HW, tk) == 1:
        if N >= 2:
            tn = pl.cdiv(N, 2)
        elif C >= 2 * sub:
            tc = min(C, _round_up(pl.cdiv(C, 2), sub))
    return tn, tc, tk


def _tiles_2d(N, C, dtype):
    """Pick (tr, tk) for a (N, C) input, byte-budgeted & dtype-aware."""
    sub = _sublane(dtype)
    budget = max(1, _TILE_BYTES // jnp.dtype(dtype).itemsize)

    tk = _lane_tile(C)
    if N * tk <= budget:
        tr = N
    else:
        tr = max(sub, (budget // tk) // sub * sub)

    # Ensure >=2 grid blocks when the whole problem would fit one step.
    if pl.cdiv(N, tr) * pl.cdiv(C, tk) == 1 and N >= 2 * sub:
        t = _round_up(pl.cdiv(N, 2), sub)
        if t < N:
            tr = t
    return tr, tk


def _add_bias_2d_pallas(x2, bias_row, donate_x=False):
    N, C = x2.shape
    tr, tk = _tiles_2d(N, C, x2.dtype)
    grid = (pl.cdiv(N, tr), pl.cdiv(C, tk))

    return pl.pallas_call(
        _add_bias_kernel,
        out_shape=jax.ShapeDtypeStruct((N, C), x2.dtype),
        grid=grid,
        in_specs=[
            pl.BlockSpec((tr, tk), lambda i, j: (i, j)),
            pl.BlockSpec((1, tk), lambda i, j: (0, j)),
        ],
        out_specs=pl.BlockSpec((tr, tk), lambda i, j: (i, j)),
        compiler_params=pltpu.CompilerParams(
            dimension_semantics=("parallel", "parallel"),
            vmem_limit_bytes=_VMEM_LIMIT,
        ),
        cost_estimate=_cost(x2, bias_row),
        input_output_aliases=({0: 0} if donate_x else {}),
    )(x2, bias_row)


def _add_bias_4d_pallas(x, bias_param, donate_x=False):
    N, C, H, W = x.shape
    HW = H * W
    x3 = x.reshape(N, C, HW)  # contiguous collapse of trailing dims
    tn, tc, tk = _tiles_4d(N, C, HW, x.dtype)
    grid = (pl.cdiv(N, tn), pl.cdiv(C, tc), pl.cdiv(HW, tk))

    out3 = pl.pallas_call(
        _add_bias_kernel,
        out_shape=jax.ShapeDtypeStruct((N, C, HW), x.dtype),
        grid=grid,
        in_specs=[
            pl.BlockSpec((tn, tc, tk), lambda n, c, k: (n, c, k)),
            # Original (C, 1) bias, indexed per channel block: no jnp.tile,
            # no extra HBM pass.
            pl.BlockSpec((tc, 1), lambda n, c, k: (c, 0)),
        ],
        out_specs=pl.BlockSpec((tn, tc, tk), lambda n, c, k: (n, c, k)),
        compiler_params=pltpu.CompilerParams(
            dimension_semantics=("parallel", "parallel", "parallel"),
            vmem_limit_bytes=_VMEM_LIMIT,
        ),
        cost_estimate=_cost(x3, bias_param),
        input_output_aliases=({0: 0} if donate_x else {}),
    )(x3, bias_param)
    return out3.reshape(N, C, H, W)


def add_bias(x, bias_param, donate_x=False):
    """Equivalent of AddBias.forward.

    bias_param: shape (C, 1) (or (C,)), matching nn.Parameter(bias.unsqueeze(1)).
    x: (N, C) or (N, C, H, W)  (NCHW layout).
    donate_x: alias x onto the output. Footprint-only optimization; only set it
      when x is truly donated at the jit boundary (reuse of x afterwards is
      undefined).
    """
    bias_param = jnp.asarray(bias_param).reshape(-1, 1).astype(x.dtype)
    C = bias_param.shape[0]

    if x.ndim == 2:
        if x.shape[1] != C:
            raise ValueError(f"channel mismatch: x has {x.shape[1]}, bias has {C}")
        # Tiny or sub-vreg-lane inputs: fused XLA add beats pallas_call
        # overhead / masked narrow stores.
        if x.nbytes < _MIN_PALLAS_BYTES or C < 128:
            return x + bias_param.reshape(1, C)
        return _add_bias_2d_pallas(x, bias_param.reshape(1, C), donate_x=donate_x)

    if x.ndim == 4:
        N, Cx, H, W = x.shape
        if Cx != C:
            raise ValueError(f"channel mismatch: x has {Cx}, bias has {C}")
        HW = H * W
        # Small activations: pallas_call launch + pipeline priming dominates.
        if x.nbytes < _MIN_PALLAS_BYTES:
            return x + bias_param.reshape(1, C, 1, 1)
        if HW < 128:
            # Lane width below one vreg row would force masked stores on every
            # tile.  Collapse to (N, C*HW) with the bias repeated per spatial
            # element (only C*HW elements) so the output is lane-dense.
            if C * HW < 128:
                return x + bias_param.reshape(1, C, 1, 1)
            bias_row = jnp.repeat(bias_param.reshape(-1), HW).reshape(1, C * HW)
            out2 = _add_bias_2d_pallas(x.reshape(N, C * HW), bias_row,
                                       donate_x=donate_x)
            return out2.reshape(N, C, H, W)
        return _add_bias_4d_pallas(x, bias_param, donate_x=donate_x)

    raise ValueError(f"AddBias supports 2D or 4D inputs, got ndim={x.ndim}")


if __name__ == "__main__":
    key = jax.random.PRNGKey(0)
    keys = jax.random.split(key, 8)

    # ---- small 4D demo matching the module's typical use (XLA fallback) ----
    C = 4
    bias_vec = jax.random.normal(keys[0], (C,), dtype=jnp.float32)
    bias_param = bias_vec[:, None]                       # (C, 1) == bias.unsqueeze(1)
    x4 = jax.random.normal(keys[1], (2, C, 16, 16), dtype=jnp.float32)
    out4 = jax.block_until_ready(add_bias(x4, bias_param))
    ref4 = x4 + bias_vec.reshape(1, C, 1, 1)

    # ---- 4D path exercising the N/C/HW-blocked Pallas kernel (HW >= 128) ----
    C2 = 64
    bias2 = jax.random.normal(keys[2], (C2,), dtype=jnp.float32)
    x4b = jax.random.normal(keys[3], (4, C2, 32, 32), dtype=jnp.float32)
    out4b = jax.block_until_ready(add_bias(x4b, bias2[:, None]))
    ref4b = x4b + bias2.reshape(1, C2, 1, 1)

    # ---- 4D path with HW < 128: lane-dense 2D collapse (Pallas) ----
    C3 = 256
    bias3 = jax.random.normal(keys[4], (C3,), dtype=jnp.float32)
    x4c = jax.random.normal(keys[5], (16, C3, 7, 7), dtype=jnp.float32)
    out4c = jax.block_until_ready(add_bias(x4c, bias3[:, None]))
    ref4c = x4c + bias3.reshape(1, C3, 1, 1)

    # ---- tiny 2D path (fused XLA fallback) ----
    x2 = jax.random.normal(keys[6], (8, C), dtype=jnp.float32)
    out2 = jax.block_until_ready(add_bias(x2, bias_param))
    ref2 = x2 + bias_vec.reshape(1, C)

    # ---- larger 2D path (tiled 2D Pallas kernel) ----
    C4 = 512
    bias4 = jax.random.normal(keys[7], (C4,), dtype=jnp.float32)
    x2b = jax.random.normal(jax.random.PRNGKey(1), (512, C4), dtype=jnp.float32)
    out2b = jax.block_until_ready(add_bias(x2b, bias4[:, None]))
    ref2b = x2b + bias4.reshape(1, C4)

    assert out4.shape == x4.shape and out4.dtype == x4.dtype
    assert out4b.shape == x4b.shape and out4b.dtype == x4b.dtype
    assert out4c.shape == x4c.shape and out4c.dtype == x4c.dtype
    assert out2.shape == x2.shape and out2.dtype == x2.dtype
    assert out2b.shape == x2b.shape and out2b.dtype == x2b.dtype
    assert jnp.allclose(out4, ref4, atol=1e-6, rtol=1e-6)
    assert jnp.allclose(out4b, ref4b, atol=1e-6, rtol=1e-6)
    assert jnp.allclose(out4c, ref4c, atol=1e-6, rtol=1e-6)
    assert jnp.allclose(out2, ref2, atol=1e-6, rtol=1e-6)
    assert jnp.allclose(out2b, ref2b, atol=1e-6, rtol=1e-6)

    print("KERNEL_OK")
</pallas_src>

<mosaic_0001>
module attributes {stable_mosaic.version = 11 : i64} {
  func.func @_add_bias_kernel(%arg0: i32, %arg1: i32, %arg2: i32, %arg3: memref<2x64x1024xf32, #tpu.memory_space<vmem>>, %arg4: memref<64x1xf32, #tpu.memory_space<vmem>>, %arg5: memref<2x64x1024xf32, #tpu.memory_space<vmem>>) attributes {dimension_semantics = [#tpu.dimension_semantics<parallel>, #tpu.dimension_semantics<parallel>, #tpu.dimension_semantics<parallel>], iteration_bounds = array<i64: 2, 1, 1>, scalar_prefetch = 0 : i64, scratch_operands = 0 : i64, tpu.core_type = #tpu.core_type<tc>, window_params = [{transform_indices = @transform_0, window_bounds = array<i64: 2, 64, 1024>}, {transform_indices = @transform_1, window_bounds = array<i64: 64, 1>}, {transform_indices = @transform_2, window_bounds = array<i64: 2, 64, 1024>}]} {
    %c0 = arith.constant 0 : index
    %c0_0 = arith.constant 0 : index
    %c0_1 = arith.constant 0 : index
    %0 = vector.load %arg3[%c0, %c0_0, %c0_1] : memref<2x64x1024xf32, #tpu.memory_space<vmem>>, vector<2x64x1024xf32>
    %c0_2 = arith.constant 0 : index
    %c0_3 = arith.constant 0 : index
    %1 = vector.load %arg4[%c0_2, %c0_3] : memref<64x1xf32, #tpu.memory_space<vmem>>, vector<64x1xf32>
    %2 = vector.shape_cast %1 : vector<64x1xf32> to vector<1x64x1xf32>
    %3 = vector.broadcast %2 : vector<1x64x1xf32> to vector<2x64x1024xf32>
    %4 = arith.addf %0, %3 : vector<2x64x1024xf32>
    %c0_4 = arith.constant 0 : index
    %c0_5 = arith.constant 0 : index
    %c0_6 = arith.constant 0 : index
    %5 = vector.load %arg5[%c0_4, %c0_5, %c0_6] : memref<2x64x1024xf32, #tpu.memory_space<vmem>>, vector<2x64x1024xf32>
    tpu.vector_store %arg5[%c0_4, %c0_5, %c0_6], %4 {strides = array<i32>} : memref<2x64x1024xf32, #tpu.memory_space<vmem>>, vector<2x64x1024xf32>,
    return
  }
  func.func @transform_0(%arg0: i32, %arg1: i32, %arg2: i32) -> (i32, i32, i32) {
    %c0_i32 = arith.constant 0 : i32
    return %arg0, %arg1, %arg2 : i32, i32, i32
  }
  func.func @transform_1(%arg0: i32, %arg1: i32, %arg2: i32) -> (i32, i32) {
    %c0_i32 = arith.constant 0 : i32
    %c0_i32_0 = arith.constant 0 : i32
    return %arg1, %c0_i32 : i32, i32
  }
  func.func @transform_2(%arg0: i32, %arg1: i32, %arg2: i32) -> (i32, i32, i32) {
    %c0_i32 = arith.constant 0 : i32
    return %arg0, %arg1, %arg2 : i32, i32, i32
  }
}

</mosaic_0001>

<bundles_post_ra>
// kernel: tpu_custom_call.1
= control target key start
LH: loop header
LB: loop body
LE: loop exit
PB: predicated region body
PF: predicated region fallthrough
CT: control target
= control target key end

     0   :  { %7 = vsyncpa [#allocation3], 0  ;;  %s1587_s0 = inlined_call_operand.hbm [shape: f32[4,64,1024], index: 0, kind: input, shape index: {}]   ;;  %s1588_s1 = inlined_call_operand.vmem [shape: f32[64,1], index: 1, kind: input, shape index: {}]   ;;  %s1589_s2 = inlined_call_operand.hbm [shape: f32[4,64,1024], index: 2, kind: output, shape index: {}]  }
   0x1   :  { %9 = vsyncpa [#allocation3 + $0x1], 0 }
   0x2   :  { %10 = vsyncpa [#allocation4], 0 }
   0x3   :  { %12 = vsyncpa [#allocation4 + $0x1], 0  ;;  %s1011_s9 = smov 0   ;;  %s1013_s10 = smov 0  }
   0x4   :  { %s1015_s11 = smov 0   ;;  %s1017_s12 = smov 0  }
   0x5   :  { %s1019_s13 = smov 0   ;;  %s1021_s14 = smov 0  }
   0x6 LB: > { %s784_s15 = sadd.s32 4294967295, %s987_s14   ;;  %s785_s16 = sadd.s32 4294967294, %s987_s14   ;;  %s987_s14 = sphi %s1021_s14, %s18_s14   ;;  %s983_s13 = sphi %s1019_s13, %s1604_s13   ;;  %s979_s12 = sphi %s1017_s12, %s1603_s12   ;;  %s975_s11 = sphi %s1015_s11, %s1602_s11   ;;  %s971_s10 = sphi %s1013_s10, %s1601_s10   ;;  %s967_s9 = sphi %s1011_s9, %s1600_s9  }
   0x7   : > { %s37_s17 = sadd.s32 1, %s983_s13  ;;  %s48_s18 = sadd.s32 1, %s975_s11 }
   0x8   : > { %p39_p0 = scmp.ge.s32.totalorder %s37_s17, 2  ;;  %p55_p1 = scmp.ne.s32.totalorder %s975_s11, %s971_s10 }
   0x9   : > { %p56_p2 = scmp.eq.s32.totalorder %s987_s14, 0  ;;  %p61_p3 = scmp.ne.s32.totalorder %s971_s10, %s967_s9 }
   0xa   : > { %s1606_s17 = smov (%p39_p0, %s37_s17), 0  ;;  %p62_p5 = scmp.eq.s32.totalorder %s784_s15, 0 }
   0xb   : > { %p1052_p4 = por %p56_p2, %p55_p1  ;;  %s41_s20 = ssub.s32 %s983_s13, %s1606_s17 }
   0xc   : > { %p115_p6 = scmp.eq.s32.totalorder %s784_s15, 1  ;;  %p46_p7 = scmp.eq.s32.totalorder %s41_s20, 0 }
   0xd   : > { %p1058_p8 = por %p62_p5, %p61_p3  ;;  %p121_p10 = scmp.eq.s32.totalorder %s785_s16, 1 }
   0xe   : > { %p1062_p9 = por %p115_p6, %p55_p1  ;;  %p818_p13 = scmp.lt.s32.totalorder %s987_s14, 2 }
   0xf   : > { %s1067_s23 = scalar_select %p46_p7, %s975_s11, %s48_s18  }
  0x10   : > { %s1593_s22 = scalar_select %p1062_p9, 1, 0 }
  0x11   : > { %p1069_p11 = por %p121_p10, %p61_p3  ;;  %s150_s25 = sand.u32 1, %s975_s11  }
  0x12   : > { %s789_s26 = sshll.u32 %s150_s25, 10  ;;  %s803_s27 = sshll.u32 %s983_s13, 14 }
  0x13   : > { %s1594_s24 = scalar_select %p1069_p11, 1, 0 }
  0x14   : > { %s1080_s30 = scalar_lea.hbm %s1587_s0, %s803_s27  ;;  %s154_s3 = scalar_lea.vmem [#allocation2], %s789_s26 }
  0x15   : > { %s167_s4 = sshll.u32 %s154_s3, 4  ;;  %p1086_p0 = pnand %p818_p13, %p1052_p4  ;;  %s1082_s4 = int_to_ptr.vmem [resolvable:$true] %s167_s4 }
  0x16   : > { %s1091_s6 = scalar_lea.sflag [#allocation3], %s150_s25  ;;  %s875_s7 = scalar_lea.hbm %s1080_s30, 16384 }
  0x17   : > { %p876_p2 = scmp.ne.s32.totalorder %s1080_s30, %s875_s7  ;;  %p877_p3 = pneg %p1086_p0 }
  0x18   : > { %s880_s16 = scalar_lea.hbm %s1587_s0, 32768  ;;  %p881_p4 = scmp.lt.u32.totalorder %s1080_s30, %s1587_s0 }
  0x19   : > { %p878_p5 = pnand %p877_p3, %p876_p2  ;;  %p882_p7 = scmp.lt.u32.totalorder %s880_s16, %s875_s7 }
  0x1a   : > { %p884_p13 = scmp.lt.u32.totalorder %s875_s7, %s1080_s30 }
  0x1b   : > { %p879_p6 = pneg %p878_p5  ;;  %p883_p10 = por %p882_p7, %p881_p4 }
  0x1d   : > { %p885_p12 = por %p884_p13, %p883_p10 }
  0x1f   : > { %p886_p1 = pnand %p885_p12, %p879_p6 }
  0x21   : > { %889 = shalt.err (!%p886_p1)
}
  0x22   : > { %s890_s20 = scalar_lea.vmem %s1082_s4, 16384  ;;  %s989_s25 = smov [#allocation2]  }
  0x23   : > { %p891_p2 = scmp.ne.s32.totalorder %s1082_s4, %s890_s20  ;;  %s895_s26 = sshll.u32 %s989_s25, 4  ;;  %s896_s26 = int_to_ptr.vmem [resolvable:$false] %s895_s26 }
  0x24   : > { %s897_s27 = scalar_lea.vmem %s896_s26, 32768  ;;  %p898_p9 = scmp.lt.s32.totalorder %s1082_s4, %s896_s26 }
  0x25   : > { %p893_p5 = pnand %p891_p2, %p877_p3  ;;  %p899_p4 = scmp.lt.s32.totalorder %s897_s27, %s890_s20 }
  0x27   : > { %p894_p11 = pneg %p893_p5  ;;  %p900_p7 = por %p899_p4, %p898_p9 }
  0x29   : > { %p901_p10 = pnand %p900_p7, %p894_p11 }
  0x2b   : > { %904 = shalt.err (!%p901_p10)
}
  0x2c   : > { %s990_s28 = smov 1024   ;;  %s991_s29 = smov 64  }
  0x2d   : > { %813 = dma.hbm_to_vmem [thread:$0]  (!%p1086_p0), %s1080_s30, 16384, %s1082_s4, %s1091_s6, %s990_s28, %s990_s28, %s991_s29  }
  0x2e   : > { %p175_p12 = scmp.lt.s32.totalorder %s987_s14, 3  ;;  %p1596_p1 = scmp.ge.s32.totalorder %s987_s14, 1 }
  0x30   : > { %p176_p3 = pnand %p1596_p1, %p175_p12 }
  0x31   : > { %s1123_s3 = sand.u32 (!%p176_p3), 1, %s971_s10  }
  0x32   : > { %179 = sbr.rel (%p176_p3) target bundleno = 269 (0x10d), region = 28  ;;  %s794_s7 = sshll.u32 (!%p176_p3), %s1123_s3, 10 }
  0x33   : > { %s182_s8 = scalar_lea.sflag (!%p176_p3), [#allocation3], %s1123_s3  ;;  %s1129_s15 = scalar_lea.vmem (!%p176_p3), [#allocation2], %s794_s7 }
  0x39   : > { %958 = dma.done.wait (%p1058_p8), %s182_s8, 16384  }
  0x3a   : > { %960 = vsyncadd (%p1058_p8), %s182_s8, 4294950912  ;;  %v992_v0 = vmov 0   ;;  %v353_v1 = vld [vmem:[%s1588_s1 + $0x10] sm:$0xff]  ;;  %v351_v2 = vld [vmem:[%s1588_s1] sm:$0xff]  ;;  %s1191_s4 = scalar_lea.vmem [#allocation5], %s794_s7  ;;  %s805_s7 = sshll.u32 %s979_s12, 14 }
  0x3b   : > { %874 = vset.pattern.permute.xlu1 %v992_v0  ;;  %873 = vset.pattern.permute.xlu0 %v992_v0  ;;  %v354_v3 = vld [vmem:[%s1588_s1 + $0x18] sm:$0xff]  ;;  %v352_v4 = vld [vmem:[%s1588_s1 + $0x8] sm:$0xff]  ;;  %v355_v6 = vld [vmem:[%s1588_s1 + $0x20] sm:$0xff]  ;;  %s675_s5 = sshll.u32 %s1191_s4, 4  ;;  %s1522_s16 = scalar_lea.hbm %s1589_s2, %s805_s7  ;;  %s1526_s5 = int_to_ptr.vmem [resolvable:$true] %s675_s5 }
  0x3c   : > { %371 = vperm.xlu1 %874, %v353_v1   ;;  %361 = vperm.xlu0 %873, %v351_v2   ;;  %v356_v5 = vld [vmem:[%s1588_s1 + $0x28] sm:$0xff]  ;;  %v358_v7 = vld [vmem:[%s1588_s1 + $0x38] sm:$0xff]  ;;  %v357_v8 = vld [vmem:[%s1588_s1 + $0x30] sm:$0xff]  ;;  %s656_s12 = scalar_lea.sflag [#allocation4], %s1123_s3  ;;  %s905_s18 = scalar_lea.vmem %s1526_s5, 16384 }
  0x3d   : > { %v239_v9 = vld [vmem:[%s1129_s15 + $0x80] sm:$0xff]  ;;  %v240_v10 = vld [vmem:[%s1129_s15 + $0x88] sm:$0xff]  ;;  %v241_v11 = vld [vmem:[%s1129_s15 + $0x90] sm:$0xff]  ;;  %p906_p8 = scmp.ne.s32.totalorder %s1526_s5, %s905_s18  ;;  %p1597_p9 = scmp.ne.s32.totalorder %s1593_s22, 0 }
  0x3e   : > { %v242_v12 = vld [vmem:[%s1129_s15 + $0x98] sm:$0xff]  ;;  %v243_v13 = vld [vmem:[%s1129_s15 + $0xa0] sm:$0xff]  ;;  %v244_v14 = vld [vmem:[%s1129_s15 + $0xa8] sm:$0xff]  ;;  %s993_s21 = smov [#allocation5]  }
  0x3f   : > { %v245_v15 = vld [vmem:[%s1129_s15 + $0xb0] sm:$0xff]  ;;  %v246_v16 = vld [vmem:[%s1129_s15 + $0xb8] sm:$0xff]  ;;  %v303_v17 = vld [vmem:[%s1129_s15 + $0x280] sm:$0xff]  ;;  %p907_p11 = pnand %p906_p8, %p1597_p9  ;;  %s909_s19 = sshll.u32 %s993_s21, 4  ;;  %s910_s19 = int_to_ptr.vmem [resolvable:$false] %s909_s19 }
  0x40   : > { %376 = vperm.xlu1 %874, %v354_v3   ;;  %366 = vperm.xlu0 %873, %v352_v4   ;;  %v304_v18 = vld [vmem:[%s1129_s15 + $0x288] sm:$0xff]  ;;  %v305_v19 = vld [vmem:[%s1129_s15 + $0x290] sm:$0xff]  ;;  %v306_v20 = vld [vmem:[%s1129_s15 + $0x298] sm:$0xff]  ;;  %s911_s20 = scalar_lea.vmem %s910_s19, 32768  ;;  %p912_p6 = scmp.lt.s32.totalorder %s1526_s5, %s910_s19 }
  0x41   : > { %v307_v21 = vld [vmem:[%s1129_s15 + $0x2a0] sm:$0xff]  ;;  %v308_v22 = vld [vmem:[%s1129_s15 + $0x2a8] sm:$0xff]  ;;  %v309_v23 = vld [vmem:[%s1129_s15 + $0x2b0] sm:$0xff]  ;;  %p908_p0 = pneg %p907_p11  ;;  %p913_p13 = scmp.lt.s32.totalorder %s911_s20, %s905_s18 }
  0x42   : > { %v310_v24 = vld [vmem:[%s1129_s15 + $0x2b8] sm:$0xff]  ;;  %v223_v26 = vld [vmem:[%s1129_s15] sm:$0xff]  ;;  %v224_v27 = vld [vmem:[%s1129_s15 + $0x8] sm:$0xff] }
  0x43   : > { %v225_v28 = vld [vmem:[%s1129_s15 + $0x10] sm:$0xff]  ;;  %v226_v29 = vld [vmem:[%s1129_s15 + $0x18] sm:$0xff]  ;;  %v227_v34 = vld [vmem:[%s1129_s15 + $0x20] sm:$0xff]  ;;  %p914_p2 = por %p913_p13, %p912_p6 }
  0x44   : > { %386 = vperm.xlu1 %874, %v356_v5   ;;  %381 = vperm.xlu0 %873, %v355_v6   ;;  %v228_v35 = vld [vmem:[%s1129_s15 + $0x28] sm:$0xff]  ;;  %v229_v36 = vld [vmem:[%s1129_s15 + $0x30] sm:$0xff]  ;;  %v230_v37 = vld [vmem:[%s1129_s15 + $0x38] sm:$0xff] }
  0x45   : > { %v287_v43 = vld [vmem:[%s1129_s15 + $0x200] sm:$0xff]  ;;  %v288_v44 = vld [vmem:[%s1129_s15 + $0x208] sm:$0xff]  ;;  %v289_v45 = vld [vmem:[%s1129_s15 + $0x210] sm:$0xff]  ;;  %p915_p5 = pnand %p914_p2, %p908_p0 }
  0x46   : > { %v290_v46 = vld [vmem:[%s1129_s15 + $0x218] sm:$0xff]  ;;  %v291_v51 = vld [vmem:[%s1129_s15 + $0x220] sm:$0xff]  ;;  %v292_v52 = vld [vmem:[%s1129_s15 + $0x228] sm:$0xff] }
  0x47   : > { %v293_v53 = vld [vmem:[%s1129_s15 + $0x230] sm:$0xff]  ;;  %v294_v54 = vld [vmem:[%s1129_s15 + $0x238] sm:$0xff]  ;;  %v247_v59 = vld [vmem:[%s1129_s15 + $0xc0] sm:$0xff] }
  0x48   : > { %396 = vperm.xlu1 %874, %v358_v7   ;;  %391 = vperm.xlu0 %873, %v357_v8   ;;  %v248_v60 = vld [vmem:[%s1129_s15 + $0xc8] sm:$0xff]  ;;  %v249_v61 = vld [vmem:[%s1129_s15 + $0xd0] sm:$0xff]  ;;  %v250_v62 = vld [vmem:[%s1129_s15 + $0xd8] sm:$0xff] }
  0x49   : > { %v251_v3 = vld [vmem:[%s1129_s15 + $0xe0] sm:$0xff]  ;;  %v252_v4 = vld [vmem:[%s1129_s15 + $0xe8] sm:$0xff]  ;;  %v253_v5 = vld [vmem:[%s1129_s15 + $0xf0] sm:$0xff] }
  0x4a   : > { %v254_v6 = vld [vmem:[%s1129_s15 + $0xf8] sm:$0xff] }
  0xbb   : > { %v372_v25 = vpop.permute.xlu1 %371  ;;  %v1183_v42 = vpop.permute.xlu0 %361 }
  0xbc   : > { %v415_v30 = vadd.f32 %v372_v25, %v239_v9  ;;  %v416_v31 = vadd.f32 %v372_v25, %v240_v10  ;;  %v417_v32 = vadd.f32 %v372_v25, %v241_v11  ;;  %v418_v33 = vadd.f32 %v372_v25, %v242_v12  ;;  %v311_v12 = vld [vmem:[%s1129_s15 + $0x2c0] sm:$0xff] }
  0xbd   : > { %v419_v38 = vadd.f32 %v372_v25, %v243_v13  ;;  %v420_v39 = vadd.f32 %v372_v25, %v244_v14  ;;  %v421_v40 = vadd.f32 %v372_v25, %v245_v15  ;;  %v422_v41 = vadd.f32 %v372_v25, %v246_v16  ;;  %v312_v13 = vld [vmem:[%s1129_s15 + $0x2c8] sm:$0xff]  ;;  %v313_v14 = vld [vmem:[%s1129_s15 + $0x2d0] sm:$0xff]  ;;  %v314_v15 = vld [vmem:[%s1129_s15 + $0x2d8] sm:$0xff] }
  0xbe   : > { %v479_v47 = vadd.f32 %v372_v25, %v303_v17  ;;  %v480_v48 = vadd.f32 %v372_v25, %v304_v18  ;;  %v481_v49 = vadd.f32 %v372_v25, %v305_v19  ;;  %v482_v50 = vadd.f32 %v372_v25, %v306_v20  ;;  %543 = vst [vmem:[%s1191_s4 + $0x80] sm:$0xff] %v415_v30  ;;  %v315_v20 = vld [vmem:[%s1129_s15 + $0x2e0] sm:$0xff]  ;;  %v233_v30 = vld [vmem:[%s1129_s15 + $0x50] sm:$0xff] }
  0xbf   : > { %544 = vst [vmem:[%s1191_s4 + $0x88] sm:$0xff] %v416_v31  ;;  %545 = vst [vmem:[%s1191_s4 + $0x90] sm:$0xff] %v417_v32  ;;  %v483_v55 = vadd.f32 %v372_v25, %v307_v21  ;;  %v484_v56 = vadd.f32 %v372_v25, %v308_v22  ;;  %v485_v57 = vadd.f32 %v372_v25, %v309_v23  ;;  %v1229_v11 = vpop.permute.xlu1 %376  ;;  %v316_v21 = vld [vmem:[%s1129_s15 + $0x2e8] sm:$0xff]  ;;  %v317_v22 = vld [vmem:[%s1129_s15 + $0x2f0] sm:$0xff] }
  0xc0   : > { %546 = vst [vmem:[%s1191_s4 + $0x98] sm:$0xff] %v418_v33  ;;  %v486_v58 = vadd.f32 %v372_v25, %v310_v24  ;;  %547 = vst [vmem:[%s1191_s4 + $0xa0] sm:$0xff] %v419_v38  ;;  %v399_v63 = vadd.f32 %v1183_v42, %v223_v26  ;;  %v400_v0 = vadd.f32 %v1183_v42, %v224_v27  ;;  %v318_v23 = vld [vmem:[%s1129_s15 + $0x2f8] sm:$0xff]  ;;  %v237_v38 = vld [vmem:[%s1129_s15 + $0x70] sm:$0xff] }
  0xc1   : > { %548 = vst [vmem:[%s1191_s4 + $0xa8] sm:$0xff] %v420_v39  ;;  %549 = vst [vmem:[%s1191_s4 + $0xb0] sm:$0xff] %v421_v40  ;;  %v401_v1 = vadd.f32 %v1183_v42, %v225_v28  ;;  %v402_v2 = vadd.f32 %v1183_v42, %v226_v29  ;;  %v403_v7 = vadd.f32 %v1183_v42, %v227_v34  ;;  %v231_v28 = vld [vmem:[%s1129_s15 + $0x40] sm:$0xff]  ;;  %v232_v29 = vld [vmem:[%s1129_s15 + $0x48] sm:$0xff] }
  0xc2   : > { %550 = vst [vmem:[%s1191_s4 + $0xb8] sm:$0xff] %v422_v41  ;;  %607 = vst [vmem:[%s1191_s4 + $0x280] sm:$0xff] %v479_v47  ;;  %v404_v8 = vadd.f32 %v1183_v42, %v228_v35  ;;  %v405_v9 = vadd.f32 %v1183_v42, %v229_v36  ;;  %v406_v10 = vadd.f32 %v1183_v42, %v230_v37  ;;  %v234_v31 = vld [vmem:[%s1129_s15 + $0x58] sm:$0xff]  ;;  %v235_v36 = vld [vmem:[%s1129_s15 + $0x60] sm:$0xff] }
  0xc3   : > { %608 = vst [vmem:[%s1191_s4 + $0x288] sm:$0xff] %v480_v48  ;;  %609 = vst [vmem:[%s1191_s4 + $0x290] sm:$0xff] %v481_v49  ;;  %v463_v16 = vadd.f32 %v1183_v42, %v287_v43  ;;  %v464_v17 = vadd.f32 %v1183_v42, %v288_v44  ;;  %v465_v18 = vadd.f32 %v1183_v42, %v289_v45  ;;  %v236_v37 = vld [vmem:[%s1129_s15 + $0x68] sm:$0xff]  ;;  %v238_v39 = vld [vmem:[%s1129_s15 + $0x78] sm:$0xff]  ;;  %v1279_v44 = vpop.permute.xlu0 %366 }
  0xc4   : > { %610 = vst [vmem:[%s1191_s4 + $0x298] sm:$0xff] %v482_v50  ;;  %611 = vst [vmem:[%s1191_s4 + $0x2a0] sm:$0xff] %v483_v55  ;;  %v466_v19 = vadd.f32 %v1183_v42, %v290_v46  ;;  %v467_v24 = vadd.f32 %v1183_v42, %v291_v51  ;;  %v468_v25 = vadd.f32 %v1183_v42, %v292_v52  ;;  %v295_v45 = vld [vmem:[%s1129_s15 + $0x240] sm:$0xff]  ;;  %v296_v46 = vld [vmem:[%s1129_s15 + $0x248] sm:$0xff] }
  0xc5   : > { %612 = vst [vmem:[%s1191_s4 + $0x2a8] sm:$0xff] %v484_v56  ;;  %613 = vst [vmem:[%s1191_s4 + $0x2b0] sm:$0xff] %v485_v57  ;;  %v469_v26 = vadd.f32 %v1183_v42, %v293_v53  ;;  %v470_v27 = vadd.f32 %v1183_v42, %v294_v54  ;;  %v423_v32 = vadd.f32 %v1229_v11, %v247_v59  ;;  %v297_v47 = vld [vmem:[%s1129_s15 + $0x250] sm:$0xff]  ;;  %v298_v48 = vld [vmem:[%s1129_s15 + $0x258] sm:$0xff] }
  0xc6   : > { %614 = vst [vmem:[%s1191_s4 + $0x2b8] sm:$0xff] %v486_v58  ;;  %527 = vst [vmem:[%s1191_s4] sm:$0xff] %v399_v63  ;;  %v424_v33 = vadd.f32 %v1229_v11, %v248_v60  ;;  %v425_v34 = vadd.f32 %v1229_v11, %v249_v61  ;;  %v426_v35 = vadd.f32 %v1229_v11, %v250_v62  ;;  %v299_v53 = vld [vmem:[%s1129_s15 + $0x260] sm:$0xff]  ;;  %v300_v54 = vld [vmem:[%s1129_s15 + $0x268] sm:$0xff] }
  0xc7   : > { %528 = vst [vmem:[%s1191_s4 + $0x8] sm:$0xff] %v400_v0  ;;  %529 = vst [vmem:[%s1191_s4 + $0x10] sm:$0xff] %v401_v1  ;;  %v427_v40 = vadd.f32 %v1229_v11, %v251_v3  ;;  %v428_v41 = vadd.f32 %v1229_v11, %v252_v4  ;;  %v429_v42 = vadd.f32 %v1229_v11, %v253_v5  ;;  %v301_v55 = vld [vmem:[%s1129_s15 + $0x270] sm:$0xff]  ;;  %v302_v56 = vld [vmem:[%s1129_s15 + $0x278] sm:$0xff] }
  0xc8   : > { %530 = vst [vmem:[%s1191_s4 + $0x18] sm:$0xff] %v402_v2  ;;  %531 = vst [vmem:[%s1191_s4 + $0x20] sm:$0xff] %v403_v7  ;;  %v430_v43 = vadd.f32 %v1229_v11, %v254_v6  ;;  %v487_v49 = vadd.f32 %v1229_v11, %v311_v12  ;;  %v488_v50 = vadd.f32 %v1229_v11, %v312_v13  ;;  %v263_v61 = vld [vmem:[%s1129_s15 + $0x140] sm:$0xff]  ;;  %v264_v62 = vld [vmem:[%s1129_s15 + $0x148] sm:$0xff]  ;;  %v1329_v13 = vpop.permute.xlu1 %386 }
  0xc9   : > { %532 = vst [vmem:[%s1191_s4 + $0x28] sm:$0xff] %v404_v8  ;;  %533 = vst [vmem:[%s1191_s4 + $0x30] sm:$0xff] %v405_v9  ;;  %v489_v51 = vadd.f32 %v1229_v11, %v313_v14  ;;  %v490_v52 = vadd.f32 %v1229_v11, %v314_v15  ;;  %v491_v57 = vadd.f32 %v1229_v11, %v315_v20  ;;  %v265_v63 = vld [vmem:[%s1129_s15 + $0x150] sm:$0xff]  ;;  %v266_v0 = vld [vmem:[%s1129_s15 + $0x158] sm:$0xff] }
  0xca   : > { %534 = vst [vmem:[%s1191_s4 + $0x38] sm:$0xff] %v406_v10  ;;  %591 = vst [vmem:[%s1191_s4 + $0x200] sm:$0xff] %v463_v16  ;;  %v492_v58 = vadd.f32 %v1229_v11, %v316_v21  ;;  %v493_v59 = vadd.f32 %v1229_v11, %v317_v22  ;;  %v494_v60 = vadd.f32 %v1229_v11, %v318_v23  ;;  %v267_v5 = vld [vmem:[%s1129_s15 + $0x160] sm:$0xff]  ;;  %v268_v6 = vld [vmem:[%s1129_s15 + $0x168] sm:$0xff] }
  0xcb   : > { %592 = vst [vmem:[%s1191_s4 + $0x208] sm:$0xff] %v464_v17  ;;  %593 = vst [vmem:[%s1191_s4 + $0x210] sm:$0xff] %v465_v18  ;;  %v407_v1 = vadd.f32 %v1279_v44, %v231_v28  ;;  %v408_v2 = vadd.f32 %v1279_v44, %v232_v29  ;;  %v409_v3 = vadd.f32 %v1279_v44, %v233_v30  ;;  %v269_v7 = vld [vmem:[%s1129_s15 + $0x170] sm:$0xff]  ;;  %v270_v8 = vld [vmem:[%s1129_s15 + $0x178] sm:$0xff] }
  0xcc   : > { %594 = vst [vmem:[%s1191_s4 + $0x218] sm:$0xff] %v466_v19  ;;  %595 = vst [vmem:[%s1191_s4 + $0x220] sm:$0xff] %v467_v24  ;;  %v410_v4 = vadd.f32 %v1279_v44, %v234_v31  ;;  %v411_v9 = vadd.f32 %v1279_v44, %v235_v36  ;;  %v412_v10 = vadd.f32 %v1279_v44, %v236_v37  ;;  %v327_v14 = vld [vmem:[%s1129_s15 + $0x340] sm:$0xff]  ;;  %v328_v15 = vld [vmem:[%s1129_s15 + $0x348] sm:$0xff] }
  0xcd   : > { %596 = vst [vmem:[%s1191_s4 + $0x228] sm:$0xff] %v468_v25  ;;  %597 = vst [vmem:[%s1191_s4 + $0x230] sm:$0xff] %v469_v26  ;;  %v413_v11 = vadd.f32 %v1279_v44, %v237_v38  ;;  %v414_v12 = vadd.f32 %v1279_v44, %v238_v39  ;;  %v329_v16 = vld [vmem:[%s1129_s15 + $0x350] sm:$0xff]  ;;  %v330_v17 = vld [vmem:[%s1129_s15 + $0x358] sm:$0xff]  ;;  %v471_v18 = vadd.f32 %v1279_v44, %v295_v45 }
  0xce   : > { %598 = vst [vmem:[%s1191_s4 + $0x238] sm:$0xff] %v470_v27  ;;  %551 = vst [vmem:[%s1191_s4 + $0xc0] sm:$0xff] %v423_v32  ;;  %v472_v19 = vadd.f32 %v1279_v44, %v296_v46  ;;  %v473_v20 = vadd.f32 %v1279_v44, %v297_v47  ;;  %v474_v21 = vadd.f32 %v1279_v44, %v298_v48  ;;  %v331_v22 = vld [vmem:[%s1129_s15 + $0x360] sm:$0xff]  ;;  %v332_v23 = vld [vmem:[%s1129_s15 + $0x368] sm:$0xff]  ;;  %v1379_v46 = vpop.permute.xlu0 %381 }
  0xcf   : > { %552 = vst [vmem:[%s1191_s4 + $0xc8] sm:$0xff] %v424_v33  ;;  %553 = vst [vmem:[%s1191_s4 + $0xd0] sm:$0xff] %v425_v34  ;;  %v333_v24 = vld [vmem:[%s1129_s15 + $0x370] sm:$0xff]  ;;  %v334_v25 = vld [vmem:[%s1129_s15 + $0x378] sm:$0xff]  ;;  %v475_v26 = vadd.f32 %v1279_v44, %v299_v53  ;;  %v476_v27 = vadd.f32 %v1279_v44, %v300_v54  ;;  %v477_v28 = vadd.f32 %v1279_v44, %v301_v55 }
  0xd0   : > { %554 = vst [vmem:[%s1191_s4 + $0xd8] sm:$0xff] %v426_v35  ;;  %555 = vst [vmem:[%s1191_s4 + $0xe0] sm:$0xff] %v427_v40  ;;  %v478_v29 = vadd.f32 %v1279_v44, %v302_v56  ;;  %v255_v30 = vld [vmem:[%s1129_s15 + $0x100] sm:$0xff]  ;;  %v256_v31 = vld [vmem:[%s1129_s15 + $0x108] sm:$0xff]  ;;  %v439_v34 = vadd.f32 %v1329_v13, %v263_v61  ;;  %v440_v35 = vadd.f32 %v1329_v13, %v264_v62 }
  0xd1   : > { %556 = vst [vmem:[%s1191_s4 + $0xe8] sm:$0xff] %v428_v41  ;;  %557 = vst [vmem:[%s1191_s4 + $0xf0] sm:$0xff] %v429_v42  ;;  %v257_v32 = vld [vmem:[%s1129_s15 + $0x110] sm:$0xff]  ;;  %v258_v33 = vld [vmem:[%s1129_s15 + $0x118] sm:$0xff]  ;;  %v441_v36 = vadd.f32 %v1329_v13, %v265_v63  ;;  %v442_v37 = vadd.f32 %v1329_v13, %v266_v0  ;;  %v443_v42 = vadd.f32 %v1329_v13, %v267_v5 }
  0xd2   : > { %558 = vst [vmem:[%s1191_s4 + $0xf8] sm:$0xff] %v430_v43  ;;  %615 = vst [vmem:[%s1191_s4 + $0x2c0] sm:$0xff] %v487_v49  ;;  %v259_v38 = vld [vmem:[%s1129_s15 + $0x120] sm:$0xff]  ;;  %v260_v39 = vld [vmem:[%s1129_s15 + $0x128] sm:$0xff]  ;;  %v444_v43 = vadd.f32 %v1329_v13, %v268_v6  ;;  %v445_v44 = vadd.f32 %v1329_v13, %v269_v7  ;;  %v446_v45 = vadd.f32 %v1329_v13, %v270_v8 }
  0xd3   : > { %616 = vst [vmem:[%s1191_s4 + $0x2c8] sm:$0xff] %v488_v50  ;;  %617 = vst [vmem:[%s1191_s4 + $0x2d0] sm:$0xff] %v489_v51  ;;  %v261_v40 = vld [vmem:[%s1129_s15 + $0x130] sm:$0xff]  ;;  %v262_v41 = vld [vmem:[%s1129_s15 + $0x138] sm:$0xff]  ;;  %v503_v51 = vadd.f32 %v1329_v13, %v327_v14  ;;  %v505_v53 = vadd.f32 %v1329_v13, %v329_v16  ;;  %v506_v54 = vadd.f32 %v1329_v13, %v330_v17 }
  0xd4   : > { %618 = vst [vmem:[%s1191_s4 + $0x2d8] sm:$0xff] %v490_v52  ;;  %619 = vst [vmem:[%s1191_s4 + $0x2e0] sm:$0xff] %v491_v57  ;;  %v319_v47 = vld [vmem:[%s1129_s15 + $0x300] sm:$0xff]  ;;  %v320_v48 = vld [vmem:[%s1129_s15 + $0x308] sm:$0xff]  ;;  %v504_v52 = vadd.f32 %v1329_v13, %v328_v15  ;;  %v509_v61 = vadd.f32 %v1329_v13, %v333_v24  ;;  %v510_v62 = vadd.f32 %v1329_v13, %v334_v25  ;;  %v1429_v15 = vpop.permute.xlu1 %396 }
  0xd5   : > { %620 = vst [vmem:[%s1191_s4 + $0x2e8] sm:$0xff] %v492_v58  ;;  %621 = vst [vmem:[%s1191_s4 + $0x2f0] sm:$0xff] %v493_v59  ;;  %v321_v49 = vld [vmem:[%s1129_s15 + $0x310] sm:$0xff]  ;;  %v322_v50 = vld [vmem:[%s1129_s15 + $0x318] sm:$0xff]  ;;  %v507_v59 = vadd.f32 %v1329_v13, %v331_v22  ;;  %v433_v5 = vadd.f32 %v1379_v46, %v257_v32  ;;  %v434_v6 = vadd.f32 %v1379_v46, %v258_v33 }
  0xd6   : > { %622 = vst [vmem:[%s1191_s4 + $0x2f8] sm:$0xff] %v494_v60  ;;  %535 = vst [vmem:[%s1191_s4 + $0x40] sm:$0xff] %v407_v1  ;;  %v323_v55 = vld [vmem:[%s1129_s15 + $0x320] sm:$0xff]  ;;  %v324_v56 = vld [vmem:[%s1129_s15 + $0x328] sm:$0xff]  ;;  %v508_v60 = vadd.f32 %v1329_v13, %v332_v23  ;;  %v437_v13 = vadd.f32 %v1379_v46, %v261_v40  ;;  %v438_v14 = vadd.f32 %v1379_v46, %v262_v41 }
  0xd7   : > { %536 = vst [vmem:[%s1191_s4 + $0x48] sm:$0xff] %v408_v2  ;;  %537 = vst [vmem:[%s1191_s4 + $0x50] sm:$0xff] %v409_v3  ;;  %v325_v57 = vld [vmem:[%s1129_s15 + $0x330] sm:$0xff]  ;;  %v326_v58 = vld [vmem:[%s1129_s15 + $0x338] sm:$0xff]  ;;  %v431_v3 = vadd.f32 %v1379_v46, %v255_v30  ;;  %v498_v22 = vadd.f32 %v1379_v46, %v322_v50 }
  0xd8   : > { %538 = vst [vmem:[%s1191_s4 + $0x58] sm:$0xff] %v410_v4  ;;  %539 = vst [vmem:[%s1191_s4 + $0x60] sm:$0xff] %v411_v9  ;;  %v279_v63 = vld [vmem:[%s1129_s15 + $0x1c0] sm:$0xff]  ;;  %v280_v0 = vld [vmem:[%s1129_s15 + $0x1c8] sm:$0xff]  ;;  %v432_v4 = vadd.f32 %v1379_v46, %v256_v31 }
  0xd9   : > { %540 = vst [vmem:[%s1191_s4 + $0x68] sm:$0xff] %v412_v10  ;;  %541 = vst [vmem:[%s1191_s4 + $0x70] sm:$0xff] %v413_v11  ;;  %v281_v1 = vld [vmem:[%s1129_s15 + $0x1d0] sm:$0xff]  ;;  %v282_v2 = vld [vmem:[%s1129_s15 + $0x1d8] sm:$0xff]  ;;  %v435_v11 = vadd.f32 %v1379_v46, %v259_v38  ;;  %v455_v33 = vadd.f32 %v1429_v15, %v279_v63 }
  0xda   : > { %542 = vst [vmem:[%s1191_s4 + $0x78] sm:$0xff] %v414_v12  ;;  %599 = vst [vmem:[%s1191_s4 + $0x240] sm:$0xff] %v471_v18  ;;  %v283_v7 = vld [vmem:[%s1129_s15 + $0x1e0] sm:$0xff]  ;;  %v284_v8 = vld [vmem:[%s1129_s15 + $0x1e8] sm:$0xff]  ;;  %v436_v12 = vadd.f32 %v1379_v46, %v260_v39 }
  0xdb   : > { %600 = vst [vmem:[%s1191_s4 + $0x248] sm:$0xff] %v472_v19  ;;  %601 = vst [vmem:[%s1191_s4 + $0x250] sm:$0xff] %v473_v20  ;;  %v285_v9 = vld [vmem:[%s1129_s15 + $0x1f0] sm:$0xff]  ;;  %v286_v10 = vld [vmem:[%s1129_s15 + $0x1f8] sm:$0xff]  ;;  %v495_v19 = vadd.f32 %v1379_v46, %v319_v47  ;;  %v496_v20 = vadd.f32 %v1379_v46, %v320_v48  ;;  %v459_v40 = vadd.f32 %v1429_v15, %v283_v7 }
  0xdc   : > { %602 = vst [vmem:[%s1191_s4 + $0x258] sm:$0xff] %v474_v21  ;;  %603 = vst [vmem:[%s1191_s4 + $0x260] sm:$0xff] %v475_v26  ;;  %v343_v16 = vld [vmem:[%s1129_s15 + $0x3c0] sm:$0xff]  ;;  %v344_v17 = vld [vmem:[%s1129_s15 + $0x3c8] sm:$0xff]  ;;  %v497_v21 = vadd.f32 %v1379_v46, %v321_v49  ;;  %v499_v26 = vadd.f32 %v1379_v46, %v323_v55  ;;  %v460_v41 = vadd.f32 %v1429_v15, %v284_v8 }
  0xdd   : > { %604 = vst [vmem:[%s1191_s4 + $0x268] sm:$0xff] %v476_v27  ;;  %605 = vst [vmem:[%s1191_s4 + $0x270] sm:$0xff] %v477_v28  ;;  %v345_v18 = vld [vmem:[%s1129_s15 + $0x3d0] sm:$0xff]  ;;  %v346_v23 = vld [vmem:[%s1129_s15 + $0x3d8] sm:$0xff]  ;;  %v500_v27 = vadd.f32 %v1379_v46, %v324_v56  ;;  %v501_v28 = vadd.f32 %v1379_v46, %v325_v57  ;;  %v519_v48 = vadd.f32 %v1429_v15, %v343_v16 }
  0xde   : > { %606 = vst [vmem:[%s1191_s4 + $0x278] sm:$0xff] %v478_v29  ;;  %567 = vst [vmem:[%s1191_s4 + $0x140] sm:$0xff] %v439_v34  ;;  %v347_v24 = vld [vmem:[%s1129_s15 + $0x3e0] sm:$0xff]  ;;  %v348_v25 = vld [vmem:[%s1129_s15 + $0x3e8] sm:$0xff]  ;;  %v502_v29 = vadd.f32 %v1379_v46, %v326_v58  ;;  %v456_v34 = vadd.f32 %v1429_v15, %v280_v0  ;;  %v520_v49 = vadd.f32 %v1429_v15, %v344_v17 }
  0xdf   : > { %568 = vst [vmem:[%s1191_s4 + $0x148] sm:$0xff] %v440_v35  ;;  %569 = vst [vmem:[%s1191_s4 + $0x150] sm:$0xff] %v441_v36  ;;  %v349_v30 = vld [vmem:[%s1129_s15 + $0x3f0] sm:$0xff]  ;;  %v350_v31 = vld [vmem:[%s1129_s15 + $0x3f8] sm:$0xff]  ;;  %v457_v35 = vadd.f32 %v1429_v15, %v281_v1  ;;  %v458_v36 = vadd.f32 %v1429_v15, %v282_v2  ;;  %v521_v50 = vadd.f32 %v1429_v15, %v345_v18 }
  0xe0   : > { %570 = vst [vmem:[%s1191_s4 + $0x158] sm:$0xff] %v442_v37  ;;  %571 = vst [vmem:[%s1191_s4 + $0x160] sm:$0xff] %v443_v42  ;;  %v271_v32 = vld [vmem:[%s1129_s15 + $0x180] sm:$0xff]  ;;  %v272_v37 = vld [vmem:[%s1129_s15 + $0x188] sm:$0xff]  ;;  %v461_v42 = vadd.f32 %v1429_v15, %v285_v9  ;;  %v523_v55 = vadd.f32 %v1429_v15, %v347_v24  ;;  %v524_v56 = vadd.f32 %v1429_v15, %v348_v25 }
  0xe1   : > { %572 = vst [vmem:[%s1191_s4 + $0x168] sm:$0xff] %v444_v43  ;;  %573 = vst [vmem:[%s1191_s4 + $0x170] sm:$0xff] %v445_v44  ;;  %v273_v38 = vld [vmem:[%s1129_s15 + $0x190] sm:$0xff]  ;;  %v274_v39 = vld [vmem:[%s1129_s15 + $0x198] sm:$0xff]  ;;  %v462_v43 = vadd.f32 %v1429_v15, %v286_v10  ;;  %v392_v44 = vpop.permute.xlu0 %391  ;;  %v525_v57 = vadd.f32 %v1429_v15, %v349_v30  ;;  %v526_v58 = vadd.f32 %v1429_v15, %v350_v31 }
  0xe2   : > { %574 = vst [vmem:[%s1191_s4 + $0x178] sm:$0xff] %v446_v45  ;;  %631 = vst [vmem:[%s1191_s4 + $0x340] sm:$0xff] %v503_v51  ;;  %v275_v45 = vld [vmem:[%s1129_s15 + $0x1a0] sm:$0xff]  ;;  %v276_v46 = vld [vmem:[%s1129_s15 + $0x1a8] sm:$0xff]  ;;  %v522_v51 = vadd.f32 %v1429_v15, %v346_v23  ;;  %v447_v1 = vadd.f32 %v392_v44, %v271_v32  ;;  %v448_v2 = vadd.f32 %v392_v44, %v272_v37 }
  0xe3   : > { %632 = vst [vmem:[%s1191_s4 + $0x348] sm:$0xff] %v504_v52  ;;  %633 = vst [vmem:[%s1191_s4 + $0x350] sm:$0xff] %v505_v53  ;;  %v277_v47 = vld [vmem:[%s1129_s15 + $0x1b0] sm:$0xff]  ;;  %v278_v52 = vld [vmem:[%s1129_s15 + $0x1b8] sm:$0xff] }
  0xe4   : > { %634 = vst [vmem:[%s1191_s4 + $0x358] sm:$0xff] %v506_v54  ;;  %635 = vst [vmem:[%s1191_s4 + $0x360] sm:$0xff] %v507_v59  ;;  %v335_v53 = vld [vmem:[%s1129_s15 + $0x380] sm:$0xff]  ;;  %v336_v54 = vld [vmem:[%s1129_s15 + $0x388] sm:$0xff]  ;;  %v453_v7 = vadd.f32 %v392_v44, %v277_v47  ;;  %v454_v8 = vadd.f32 %v392_v44, %v278_v52 }
  0xe5   : > { %636 = vst [vmem:[%s1191_s4 + $0x368] sm:$0xff] %v508_v60  ;;  %637 = vst [vmem:[%s1191_s4 + $0x370] sm:$0xff] %v509_v61  ;;  %v337_v59 = vld [vmem:[%s1129_s15 + $0x390] sm:$0xff]  ;;  %v338_v60 = vld [vmem:[%s1129_s15 + $0x398] sm:$0xff]  ;;  %v511_v9 = vadd.f32 %v392_v44, %v335_v53  ;;  %v512_v10 = vadd.f32 %v392_v44, %v336_v54 }
  0xe6   : > { %638 = vst [vmem:[%s1191_s4 + $0x378] sm:$0xff] %v510_v62  ;;  %559 = vst [vmem:[%s1191_s4 + $0x100] sm:$0xff] %v431_v3  ;;  %v339_v61 = vld [vmem:[%s1129_s15 + $0x3a0] sm:$0xff]  ;;  %v340_v62 = vld [vmem:[%s1129_s15 + $0x3a8] sm:$0xff]  ;;  %v449_v3 = vadd.f32 %v392_v44, %v273_v38 }
  0xe7   : > { %560 = vst [vmem:[%s1191_s4 + $0x108] sm:$0xff] %v432_v4  ;;  %561 = vst [vmem:[%s1191_s4 + $0x110] sm:$0xff] %v433_v5  ;;  %v341_v63 = vld [vmem:[%s1129_s15 + $0x3b0] sm:$0xff]  ;;  %v342_v0 = vld [vmem:[%s1129_s15 + $0x3b8] sm:$0xff]  ;;  %v450_v4 = vadd.f32 %v392_v44, %v274_v39  ;;  %v451_v5 = vadd.f32 %v392_v44, %v275_v45 }
  0xe8   : > { %562 = vst [vmem:[%s1191_s4 + $0x118] sm:$0xff] %v434_v6  ;;  %563 = vst [vmem:[%s1191_s4 + $0x120] sm:$0xff] %v435_v11  ;;  %v452_v6 = vadd.f32 %v392_v44, %v276_v46  ;;  %v513_v11 = vadd.f32 %v392_v44, %v337_v59  ;;  %v517_v15 = vadd.f32 %v392_v44, %v341_v63 }
  0xe9   : > { %564 = vst [vmem:[%s1191_s4 + $0x128] sm:$0xff] %v436_v12  ;;  %565 = vst [vmem:[%s1191_s4 + $0x130] sm:$0xff] %v437_v13  ;;  %v514_v12 = vadd.f32 %v392_v44, %v338_v60  ;;  %v515_v13 = vadd.f32 %v392_v44, %v339_v61  ;;  %v518_v16 = vadd.f32 %v392_v44, %v342_v0 }
  0xea   : > { %566 = vst [vmem:[%s1191_s4 + $0x138] sm:$0xff] %v438_v14  ;;  %623 = vst [vmem:[%s1191_s4 + $0x300] sm:$0xff] %v495_v19  ;;  %v516_v14 = vadd.f32 %v392_v44, %v340_v62 }
  0xeb   : > { %624 = vst [vmem:[%s1191_s4 + $0x308] sm:$0xff] %v496_v20  ;;  %625 = vst [vmem:[%s1191_s4 + $0x310] sm:$0xff] %v497_v21 }
  0xec   : > { %626 = vst [vmem:[%s1191_s4 + $0x318] sm:$0xff] %v498_v22  ;;  %627 = vst [vmem:[%s1191_s4 + $0x320] sm:$0xff] %v499_v26 }
  0xed   : > { %628 = vst [vmem:[%s1191_s4 + $0x328] sm:$0xff] %v500_v27  ;;  %629 = vst [vmem:[%s1191_s4 + $0x330] sm:$0xff] %v501_v28 }
  0xee   : > { %630 = vst [vmem:[%s1191_s4 + $0x338] sm:$0xff] %v502_v29  ;;  %583 = vst [vmem:[%s1191_s4 + $0x1c0] sm:$0xff] %v455_v33 }
  0xef   : > { %584 = vst [vmem:[%s1191_s4 + $0x1c8] sm:$0xff] %v456_v34  ;;  %585 = vst [vmem:[%s1191_s4 + $0x1d0] sm:$0xff] %v457_v35 }
  0xf0   : > { %586 = vst [vmem:[%s1191_s4 + $0x1d8] sm:$0xff] %v458_v36  ;;  %587 = vst [vmem:[%s1191_s4 + $0x1e0] sm:$0xff] %v459_v40 }
  0xf1   : > { %588 = vst [vmem:[%s1191_s4 + $0x1e8] sm:$0xff] %v460_v41  ;;  %589 = vst [vmem:[%s1191_s4 + $0x1f0] sm:$0xff] %v461_v42 }
  0xf2   : > { %590 = vst [vmem:[%s1191_s4 + $0x1f8] sm:$0xff] %v462_v43  ;;  %647 = vst [vmem:[%s1191_s4 + $0x3c0] sm:$0xff] %v519_v48 }
  0xf3   : > { %648 = vst [vmem:[%s1191_s4 + $0x3c8] sm:$0xff] %v520_v49  ;;  %649 = vst [vmem:[%s1191_s4 + $0x3d0] sm:$0xff] %v521_v50 }
  0xf4   : > { %650 = vst [vmem:[%s1191_s4 + $0x3d8] sm:$0xff] %v522_v51  ;;  %651 = vst [vmem:[%s1191_s4 + $0x3e0] sm:$0xff] %v523_v55 }
  0xf5   : > { %652 = vst [vmem:[%s1191_s4 + $0x3e8] sm:$0xff] %v524_v56  ;;  %653 = vst [vmem:[%s1191_s4 + $0x3f0] sm:$0xff] %v525_v57 }
  0xf6   : > { %654 = vst [vmem:[%s1191_s4 + $0x3f8] sm:$0xff] %v526_v58  ;;  %575 = vst [vmem:[%s1191_s4 + $0x180] sm:$0xff] %v447_v1 }
  0xf7   : > { %576 = vst [vmem:[%s1191_s4 + $0x188] sm:$0xff] %v448_v2  ;;  %577 = vst [vmem:[%s1191_s4 + $0x190] sm:$0xff] %v449_v3 }
  0xf8   : > { %578 = vst [vmem:[%s1191_s4 + $0x198] sm:$0xff] %v450_v4  ;;  %579 = vst [vmem:[%s1191_s4 + $0x1a0] sm:$0xff] %v451_v5 }
  0xf9   : > { %580 = vst [vmem:[%s1191_s4 + $0x1a8] sm:$0xff] %v452_v6  ;;  %581 = vst [vmem:[%s1191_s4 + $0x1b0] sm:$0xff] %v453_v7 }
  0xfa   : > { %582 = vst [vmem:[%s1191_s4 + $0x1b8] sm:$0xff] %v454_v8  ;;  %639 = vst [vmem:[%s1191_s4 + $0x380] sm:$0xff] %v511_v9 }
  0xfb   : > { %640 = vst [vmem:[%s1191_s4 + $0x388] sm:$0xff] %v512_v10  ;;  %641 = vst [vmem:[%s1191_s4 + $0x390] sm:$0xff] %v513_v11 }
  0xfc   : > { %642 = vst [vmem:[%s1191_s4 + $0x398] sm:$0xff] %v514_v12  ;;  %643 = vst [vmem:[%s1191_s4 + $0x3a0] sm:$0xff] %v515_v13 }
  0xfd   : > { %644 = vst [vmem:[%s1191_s4 + $0x3a8] sm:$0xff] %v516_v14  ;;  %645 = vst [vmem:[%s1191_s4 + $0x3b0] sm:$0xff] %v517_v15 }
  0xfe   : > { %646 = vst [vmem:[%s1191_s4 + $0x3b8] sm:$0xff] %v518_v16 }
  0xff   : > { %918 = shalt.err (!%p915_p5)
}
 0x100   : > { %s919_s25 = scalar_lea.hbm %s1522_s16, 16384  ;;  %s923_s28 = scalar_lea.hbm %s1589_s2, 32768 }
 0x101   : > { %p920_p4 = scmp.ne.s32.totalorder %s1522_s16, %s919_s25  ;;  %p924_p12 = scmp.lt.u32.totalorder %s1522_s16, %s1589_s2 }
 0x102   : > { %p925_p1 = scmp.lt.u32.totalorder %s923_s28, %s919_s25  ;;  %p927_p8 = scmp.lt.u32.totalorder %s919_s25, %s1522_s16 }
 0x103   : > { %p921_p7 = pnand %p920_p4, %p1597_p9 }
 0x104   : > { %p926_p3 = por %p925_p1, %p924_p12 }
 0x105   : > { %p922_p10 = pneg %p921_p7 }
 0x106   : > { %p928_p11 = por %p927_p8, %p926_p3 }
 0x108   : > { %p929_p0 = pnand %p928_p11, %p922_p10 }
 0x10a   : > { %932 = shalt.err (!%p929_p0)
}
 0x10b   : > { %s994_s30 = smov 1024   ;;  %s995_s4 = smov 64  }
 0x10c   : > { %808 = dma.vmem_to_hbm [thread:$0]  (%p1597_p9), %s1526_s5, 16384, %s1522_s16, %s656_s12, %s994_s30, %s994_s30, %s995_s4  }
 0x10d PF: > { %s690_s7 = sand.u32 1, %s967_s9   ;;  %p1598_p6 = scmp.ne.s32.totalorder %s1594_s24, 0 }
 0x10e   : > { %p1599_p13 = scmp.ge.s32.totalorder %s987_s14, 2  ;;  %s691_s15 = scalar_lea.sflag [#allocation4], %s690_s7 }
 0x110   : > { %p815_p2 = pnand %p1599_p13, %p1598_p6 }
 0x112   : > { %962 = dma.done.wait (!%p815_p2), %s691_s15, 16384  }
 0x113   : > { %964 = vsyncadd (!%p815_p2), %s691_s15, 4294950912  ;;  %s18_s14 = sadd.s32 1, %s987_s14   ;;  %s1600_s9 = smov %s971_s10 }
 0x114   : > { %p15_p5 = scmp.ge.s32.totalorder %s18_s14, 4   ;;  %s1601_s10 = smov %s975_s11 }
 0x115   : > { %s1602_s11 = smov %s1067_s23  ;;  %s1603_s12 = smov %s983_s13 }
 0x116   : > { %s1604_s13 = smov %s1606_s17  ;;  %17 = sbr.rel (!%p15_p5) target bundleno = 6 (0x6), region = 76 }
 0x11d   :  { %696 = vsyncpa [#allocation3], 1 }
 0x11e   :  { %698 = vsyncpa [#allocation3 + $0x1], 1 }
 0x11f   :  { %699 = vsyncpa [#allocation4], 1 }
 0x120   :  { %701 = vsyncpa [#allocation4 + $0x1], 1 }

</bundles_post_ra>
